<compile_context>
chip_gen: v7x
topology: tpu7x:2x2x1
jax: 0.10.0
libtpu: 0.0.40
codegen_flags: <defaults>
</compile_context>

<pallas_src>
import jax
import jax.numpy as jnp
from jax import lax
from jax.experimental import pallas as pl
from jax.experimental.pallas import tpu as pltpu


def _round_up(n, m):
    return ((n + m - 1) // m) * m


def _cdiv(a, b):
    return (a + b - 1) // b


def mlp_kernel(x_ref, w1_ref, b1_ref, w2_ref, b2_ref, w3_ref, b3_ref, o_ref):
    # x_ref: [TILE_B, input_size] f32 (native layout, streamed per grid step)
    x = x_ref[...]

    # Layer 1: h1[o, b] = sum_k W1[o, k] * x[b, k]  -> [20, TILE_B]
    # Contract x's feature (minor) dim directly; batch ends up on lanes.
    h1 = lax.dot_general(
        w1_ref[...], x, (((1,), (1,)), ((), ())),
        preferred_element_type=jnp.float32)
    h1 = jnp.maximum(h1 + b1_ref[...], 0.0)

    # Layer 2: Linear(20 -> 10) + ReLU  -> [10, TILE_B]
    h2 = jnp.dot(w2_ref[...], h1, preferred_element_type=jnp.float32)
    h2 = jnp.maximum(h2 + b2_ref[...], 0.0)

    # Layer 3: Linear(10 -> 2), no activation -> [2, TILE_B], lane-dense store.
    o = jnp.dot(w3_ref[...], h2, preferred_element_type=jnp.float32) + b3_ref[...]
    o_ref[...] = o.astype(o_ref.dtype)


def mlp_pallas(x, w1, b1, w2, b2, w3, b3, *, tile_b=8192):
    """x: [batch, input_size] f32. Weights in PyTorch layout [out, in], biases [out]."""
    batch, input_size = x.shape
    out_features = w3.shape[0]

    # Choose the batch tile.  When the grid has >1 step, the output block's
    # lane dim (tile_b) must be a multiple of 128; a single full-array block
    # has no such constraint.
    tile_b = max(128, _round_up(min(tile_b, batch), 128))
    if tile_b >= batch:
        tile_b = batch  # single block covering the whole batch
        if batch >= 256:
            # Keep >=2 grid steps so the batch can shard across v7x's 2 TCs.
            half = _round_up(_cdiv(batch, 2), 128)
            if half < batch:
                tile_b = half
    grid = (_cdiv(batch, tile_b),)

    # Biases as [out, 1] f32 -> broadcast across the lane (batch) axis in-kernel.
    b1c = b1.reshape(-1, 1).astype(jnp.float32)
    b2c = b2.reshape(-1, 1).astype(jnp.float32)
    b3c = b3.reshape(-1, 1).astype(jnp.float32)
    w1f = w1.astype(jnp.float32)
    w2f = w2.astype(jnp.float32)
    w3f = w3.astype(jnp.float32)

    # Constant index_map: weights/biases are DMA'd once and stay VMEM-resident
    # across all grid steps.
    resident = lambda arr: pl.BlockSpec(arr.shape, lambda i: (0, 0))

    out_t = pl.pallas_call(
        mlp_kernel,
        out_shape=jax.ShapeDtypeStruct((out_features, batch), jnp.float32),
        grid=grid,
        in_specs=[
            pl.BlockSpec((tile_b, input_size), lambda i: (i, 0)),  # x tile (native layout)
            resident(w1f), resident(b1c),
            resident(w2f), resident(b2c),
            resident(w3f), resident(b3c),
        ],
        out_specs=pl.BlockSpec((out_features, tile_b), lambda i: (0, i)),
        compiler_params=pltpu.CompilerParams(
            dimension_semantics=("parallel",),
            vmem_limit_bytes=32 * 1024 * 1024,
        ),
    )(x, w1f, b1c, w2f, b2c, w3f, b3c)

    # Kernel emits [2, batch] (lane-dense stores); transpose back to the
    # PyTorch-facing [batch, 2].  This is ~16 B/sample, small vs the 64 B/sample
    # f32 x stream.
    return out_t.T


def init_linear_params(key, fan_in, fan_out):
    # PyTorch default init: U(-1/sqrt(fan_in), 1/sqrt(fan_in)); layout [out, in].
    kw, kb = jax.random.split(key)
    bound = 1.0 / jnp.sqrt(jnp.float32(fan_in))
    w = jax.random.uniform(kw, (fan_out, fan_in), jnp.float32, -bound, bound)
    b = jax.random.uniform(kb, (fan_out,), jnp.float32, -bound, bound)
    return w, b


def reference_mlp(x, w1, b1, w2, b2, w3, b3):
    # f32 reference (HIGHEST precision so the XLA matmuls don't downcast to bf16).
    hp = lax.Precision.HIGHEST
    h1 = jnp.maximum(jnp.dot(x, w1.T, precision=hp) + b1, 0.0)
    h2 = jnp.maximum(jnp.dot(h1, w2.T, precision=hp) + b2, 0.0)
    return jnp.dot(h2, w3.T, precision=hp) + b3


if __name__ == "__main__":
    input_size = 16
    batch = 2

    key = jax.random.PRNGKey(0)
    kx, k1, k2, k3 = jax.random.split(key, 4)

    x = jax.random.normal(kx, (batch, input_size), jnp.float32)
    w1, b1 = init_linear_params(k1, input_size, 20)
    w2, b2 = init_linear_params(k2, 20, 10)
    w3, b3 = init_linear_params(k3, 10, 2)

    out = mlp_pallas(x, w1, b1, w2, b2, w3, b3)
    out = jax.block_until_ready(out)

    ref = reference_mlp(x, w1, b1, w2, b2, w3, b3)

    assert out.shape == (batch, 2), out.shape
    assert jnp.allclose(out, ref, atol=1e-3, rtol=1e-3), "mismatch vs reference"

    print("KERNEL_OK")
</pallas_src>

<mosaic_0001>
module attributes {stable_mosaic.version = 11 : i64} {
  func.func @mlp_kernel(%arg0: i32, %arg1: memref<2x16xf32, #tpu.memory_space<vmem>>, %arg2: memref<20x16xf32, #tpu.memory_space<vmem>>, %arg3: memref<20x1xf32, #tpu.memory_space<vmem>>, %arg4: memref<10x20xf32, #tpu.memory_space<vmem>>, %arg5: memref<10x1xf32, #tpu.memory_space<vmem>>, %arg6: memref<2x10xf32, #tpu.memory_space<vmem>>, %arg7: memref<2x1xf32, #tpu.memory_space<vmem>>, %arg8: memref<2x2xf32, #tpu.memory_space<vmem>>) attributes {dimension_semantics = [#tpu.dimension_semantics<parallel>], iteration_bounds = array<i64: 1>, scalar_prefetch = 0 : i64, scratch_operands = 0 : i64, tpu.core_type = #tpu.core_type<tc>, window_params = [{transform_indices = @transform_0, window_bounds = array<i64: 2, 16>}, {pipeline_mode = #tpu.pipeline_mode<synchronous>, transform_indices = @transform_1, window_bounds = array<i64: 20, 16>}, {pipeline_mode = #tpu.pipeline_mode<synchronous>, transform_indices = @transform_2, window_bounds = array<i64: 20, 1>}, {pipeline_mode = #tpu.pipeline_mode<synchronous>, transform_indices = @transform_3, window_bounds = array<i64: 10, 20>}, {pipeline_mode = #tpu.pipeline_mode<synchronous>, transform_indices = @transform_4, window_bounds = array<i64: 10, 1>}, {pipeline_mode = #tpu.pipeline_mode<synchronous>, transform_indices = @transform_5, window_bounds = array<i64: 2, 10>}, {pipeline_mode = #tpu.pipeline_mode<synchronous>, transform_indices = @transform_6, window_bounds = array<i64: 2, 1>}, {transform_indices = @transform_7, window_bounds = array<i64: 2, 2>}]} {
    %c0 = arith.constant 0 : index
    %c0_0 = arith.constant 0 : index
    %0 = vector.load %arg1[%c0, %c0_0] : memref<2x16xf32, #tpu.memory_space<vmem>>, vector<2x16xf32>
    %c0_1 = arith.constant 0 : index
    %c0_2 = arith.constant 0 : index
    %1 = vector.load %arg2[%c0_1, %c0_2] : memref<20x16xf32, #tpu.memory_space<vmem>>, vector<20x16xf32>
    %cst = arith.constant dense<0.000000e+00> : vector<20x2xf32>
    %2 = tpu.matmul %1, %0, %cst {dimension_numbers = #tpu.dot_dimension_numbers<[1], [1], [0], [0], [0, 0, 1, 0], [], []>} : vector<20x16xf32>, vector<2x16xf32>, vector<20x2xf32> -> vector<20x2xf32>
    %c0_3 = arith.constant 0 : index
    %c0_4 = arith.constant 0 : index
    %3 = vector.load %arg3[%c0_3, %c0_4] : memref<20x1xf32, #tpu.memory_space<vmem>>, vector<20x1xf32>
    %4 = vector.broadcast %3 : vector<20x1xf32> to vector<20x2xf32>
    %5 = arith.addf %2, %4 : vector<20x2xf32>
    %cst_5 = arith.constant 0.000000e+00 : f32
    %6 = vector.broadcast %cst_5 : f32 to vector<20x2xf32>
    %7 = arith.maximumf %5, %6 : vector<20x2xf32>
    %c0_6 = arith.constant 0 : index
    %c0_7 = arith.constant 0 : index
    %8 = vector.load %arg4[%c0_6, %c0_7] : memref<10x20xf32, #tpu.memory_space<vmem>>, vector<10x20xf32>
    %cst_8 = arith.constant dense<0.000000e+00> : vector<10x2xf32>
    %9 = tpu.matmul %8, %7, %cst_8 {dimension_numbers = #tpu.dot_dimension_numbers<[1], [0], [0], [1], [0, 0, 1, 1], [], []>} : vector<10x20xf32>, vector<20x2xf32>, vector<10x2xf32> -> vector<10x2xf32>
    %c0_9 = arith.constant 0 : index
    %c0_10 = arith.constant 0 : index
    %10 = vector.load %arg5[%c0_9, %c0_10] : memref<10x1xf32, #tpu.memory_space<vmem>>, vector<10x1xf32>
    %11 = vector.broadcast %10 : vector<10x1xf32> to vector<10x2xf32>
    %12 = arith.addf %9, %11 : vector<10x2xf32>
    %cst_11 = arith.constant 0.000000e+00 : f32
    %13 = vector.broadcast %cst_11 : f32 to vector<10x2xf32>
    %14 = arith.maximumf %12, %13 : vector<10x2xf32>
    %c0_12 = arith.constant 0 : index
    %c0_13 = arith.constant 0 : index
    %15 = vector.load %arg6[%c0_12, %c0_13] : memref<2x10xf32, #tpu.memory_space<vmem>>, vector<2x10xf32>
    %cst_14 = arith.constant dense<0.000000e+00> : vector<2x2xf32>
    %16 = tpu.matmul %15, %14, %cst_14 {dimension_numbers = #tpu.dot_dimension_numbers<[1], [0], [0], [1], [0, 0, 1, 1], [], []>} : vector<2x10xf32>, vector<10x2xf32>, vector<2x2xf32> -> vector<2x2xf32>
    %c0_15 = arith.constant 0 : index
    %c0_16 = arith.constant 0 : index
    %17 = vector.load %arg7[%c0_15, %c0_16] : memref<2x1xf32, #tpu.memory_space<vmem>>, vector<2x1xf32>
    %18 = vector.broadcast %17 : vector<2x1xf32> to vector<2x2xf32>
    %19 = arith.addf %16, %18 : vector<2x2xf32>
    %c0_17 = arith.constant 0 : index
    %c0_18 = arith.constant 0 : index
    %20 = vector.load %arg8[%c0_17, %c0_18] : memref<2x2xf32, #tpu.memory_space<vmem>>, vector<2x2xf32>
    tpu.vector_store %arg8[%c0_17, %c0_18], %19 {strides = array<i32>} : memref<2x2xf32, #tpu.memory_space<vmem>>, vector<2x2xf32>,
    return
  }
  func.func @transform_0(%arg0: i32) -> (i32, i32) {
    %c0_i32 = arith.constant 0 : i32
    %c0_i32_0 = arith.constant 0 : i32
    return %arg0, %c0_i32 : i32, i32
  }
  func.func @transform_1(%arg0: i32) -> (i32, i32) {
    %c0_i32 = arith.constant 0 : i32
    %c0_i32_0 = arith.constant 0 : i32
    %c0_i32_1 = arith.constant 0 : i32
    return %c0_i32, %c0_i32_0 : i32, i32
  }
  func.func @transform_2(%arg0: i32) -> (i32, i32) {
    %c0_i32 = arith.constant 0 : i32
    %c0_i32_0 = arith.constant 0 : i32
    %c0_i32_1 = arith.constant 0 : i32
    return %c0_i32, %c0_i32_0 : i32, i32
  }
  func.func @transform_3(%arg0: i32) -> (i32, i32) {
    %c0_i32 = arith.constant 0 : i32
    %c0_i32_0 = arith.constant 0 : i32
    %c0_i32_1 = arith.constant 0 : i32
    return %c0_i32, %c0_i32_0 : i32, i32
  }
  func.func @transform_4(%arg0: i32) -> (i32, i32) {
    %c0_i32 = arith.constant 0 : i32
    %c0_i32_0 = arith.constant 0 : i32
    %c0_i32_1 = arith.constant 0 : i32
    return %c0_i32, %c0_i32_0 : i32, i32
  }
  func.func @transform_5(%arg0: i32) -> (i32, i32) {
    %c0_i32 = arith.constant 0 : i32
    %c0_i32_0 = arith.constant 0 : i32
    %c0_i32_1 = arith.constant 0 : i32
    return %c0_i32, %c0_i32_0 : i32, i32
  }
  func.func @transform_6(%arg0: i32) -> (i32, i32) {
    %c0_i32 = arith.constant 0 : i32
    %c0_i32_0 = arith.constant 0 : i32
    %c0_i32_1 = arith.constant 0 : i32
    return %c0_i32, %c0_i32_0 : i32, i32
  }
  func.func @transform_7(%arg0: i32) -> (i32, i32) {
    %c0_i32 = arith.constant 0 : i32
    %c0_i32_0 = arith.constant 0 : i32
    return %c0_i32, %arg0 : i32, i32
  }
}

</mosaic_0001>

<bundles_post_ra>
// kernel: tpu_custom_call.1
= control target key start
LH: loop header
LB: loop body
LE: loop exit
PB: predicated region body
PF: predicated region fallthrough
CT: control target
= control target key end

     0   :  { %vm49_vm0 = vcmask 130048   ;;  %v436_v1 = vmov 0.0   ;;  %vm437_vm1 = vmmov 0   ;;  %v438_v4 = vmov 0   ;;  %s543_s0 = inlined_call_operand.vmem [shape: f32[2,16], index: 0, kind: input, shape index: {}]   ;;  %s544_s1 = inlined_call_operand.vmem [shape: f32[20,16], index: 1, kind: input, shape index: {}]   ;;  %s545_s2 = inlined_call_operand.vmem [shape: f32[20,1], index: 2, kind: input, shape index: {}]   ;;  %s546_s3 = inlined_call_operand.vmem [shape: f32[10,20], index: 3, kind: input, shape index: {}]   ;;  %s547_s4 = inlined_call_operand.vmem [shape: f32[10,1], index: 4, kind: input, shape index: {}]   ;;  %s548_s5 = inlined_call_operand.vmem [shape: f32[2,10], index: 5, kind: input, shape index: {}]   ;;  %s549_s6 = inlined_call_operand.vmem [shape: f32[2,1], index: 6, kind: input, shape index: {}]   ;;  %s550_s7 = inlined_call_operand.hbm [shape: f32[2,2], index: 7, kind: output, shape index: {}]  }
   0x1   :  { %v27_v0 = vld [vmem:[%s543_s0] sm:$0x3]  ;;  %369 = vmatprep.subr.mxu0 %v436_v1  ;;  %371 = vmatprep.mubr.msk.f32.mxu0 %vm437_vm1, %v436_v1  ;;  %v33_v5 = vld [vmem:[%s545_s2 + $0x10] sm:$0xf] }
   0x2   :  { %v31_v2 = vld [vmem:[%s545_s2] sm:$0xff]  ;;  %370 = vmatpush3.xpose.msk.msra.mxu0 %vm49_vm0, %v27_v0  ;;  %410 = vset.pattern.permute.xlu0 %v438_v4 }
   0x3   :  { %v28_v3 = vld [vmem:[%s544_s1] sm:$0xff]  ;;  %36 = vperm.xlu0 %410, %v31_v2   ;;  %411 = vset.pattern.permute.xlu1 %v438_v4 }
   0x4   :  { %12 = vsyncpa [#allocation3], 0  ;;  %v32_v6 = vld [vmem:[%s545_s2 + $0x8] sm:$0xff]  ;;  %46 = vperm.xlu1 %411, %v33_v5   ;;  %v147_v7 = vld [vmem:[%s547_s4] sm:$0xff]  ;;  %vm159_vm2 = vcmask 162816   ;;  %vm166_vm3 = vcmask 1043456  }
   0x5   :  { %372 = vmatmul.mubr.msk.f32.vlgmr.msra.gmra.mrb[0].mxu0 %vm49_vm0, %v28_v3  ;;  %v29_v8 = vld [vmem:[%s544_s1 + $0x8] sm:$0xff]  ;;  %v248_v10 = vld [vmem:[%s549_s6] sm:$0x3]  ;;  %v30_v11 = vld [vmem:[%s544_s1 + $0x10] sm:$0xf]  ;;  %v439_v30 = vmov 0.0|0.0  }
   0x6   :  { %374 = vmatprep.mubr.msk.f32.mxu0 %vm437_vm1, %v436_v1  ;;  %v148_v9 = vld [vmem:[%s547_s4 + $0x8] sm:$0x3]  ;;  %v145_v12 = vld [vmem:[%s546_s3] sm:$0xff]  ;;  %vm258_vm4 = vcmask 1041408   ;;  %vm440_vm5 = vmmov 1   ;;  %vm254_vm7 = vcmask 80896  }
   0x7   :  { %41 = vperm.xlu0 %410, %v32_v6   ;;  %386 = vmatprep.mubr.msk.f32.mxu1 %vm159_vm2, %v145_v12  ;;  %v146_v29 = vld [vmem:[%s546_s3 + $0x8] sm:$0x3]  ;;  %vm402_vm6 = vmpackc.low %vm258_vm4, %vm440_vm5  ;;  %v247_v40 = vld [vmem:[%s548_s5] sm:$0x3]  ;;  %s441_s21 = smov [#allocation2]   ;;  %vm332_vm8 = vcmask 9216  }
   0x8   :  { %151 = vperm.xlu1 %411, %v147_v7   ;;  %s340_s22 = sshll.u32 %s441_s21, 4  ;;  %s341_s22 = int_to_ptr.vmem [resolvable:$true] %s340_s22 }
   0x9   :  { %375 = vmatmul.mubr.msk.f32.gmra.mrb[2].mxu0 %vm49_vm0, %v29_v8  ;;  %s412_s23 = scalar_lea.vmem %s341_s22, 32  ;;  %p417_p1 = scmp.lt.s32.totalorder %s341_s22, %s341_s22 }
   0xa   :  { %377 = vmatprep.mubr.msk.f32.mxu0 %vm437_vm1, %v436_v1  ;;  %p413_p0 = scmp.ne.s32.totalorder %s341_s22, %s412_s23  ;;  %p418_p2 = scmp.lt.s32.totalorder %s412_s23, %s412_s23 }
   0xb   :  { %156 = vperm.xlu0 %410, %v148_v9  }
   0xc   :  { %251 = vperm.xlu1 %411, %v248_v10   ;;  %p419_p3 = por %p418_p2, %p417_p1 }
   0xd   :  { %378 = vmatmul.mubr.msk.f32.gmra.mrb[4].mxu0 %vm49_vm0, %v30_v11 }
   0xe   :  { %p420_p4 = pnand %p419_p3, %p413_p0 }
  0x82   :  { %v37_v13 = vpop.permute.xlu0 %36 }
  0x83   :  { %v47_v23 = vpop.permute.xlu1 %46 }
  0x86   :  { %v42_v17 = vpop.permute.xlu0 %41 }
  0x87   :  { %v152_v33 = vpop.permute.xlu1 %151 }
  0x8a   :  { %v157_v31 = vpop.permute.xlu0 %156 }
  0x8b   :  { %v252_v41 = vpop.permute.xlu1 %251 }
  0xd8   :  { %v128_v14 = vpop.f32.mrb[0].mxu0 }
  0xd9   :  { %v373_v15 = vpop.f32.mrb[1].mxu0  ;;  %v129_v16 = vadd.f32 %v128_v14, %v37_v13 }
  0xdb   :  { %v142_v21 = vmax.f32 %v129_v16, 0.0 }
  0xdc   :  { %v133_v18 = vpop.f32.mrb[2].mxu0 }
  0xdd   :  { %v134_v19 = vadd.f32 %v133_v18, %v42_v17  ;;  %v376_v20 = vpop.f32.mrb[3].mxu0 }
  0xdf   :  { %v143_v22 = vmax.f32 %v134_v19, 0.0 }
  0xe0   :  { %v138_v24 = vpop.f32.mrb[4].mxu0 }
  0xe1   :  { %v139_v25 = vadd.f32 %v138_v24, %v47_v23  ;;  %v379_v26 = vpop.f32.mrb[5].mxu0  ;;  %v396_v27 = vpack.c.bf16 %v143_v22, %v142_v21 }
  0xe3   :  { %v144_v28 = vmax.f32 %v139_v25, 0.0  ;;  %397 = vmatprep.subr.bf16.mxu1 %v396_v27 }
  0xe4   :  { %399 = vmatpush3.bf16.msra.mxu1 %v396_v27 }
  0xe5   :  { %384 = vmatprep.subr.msk.mxu1 %vm166_vm3, %v144_v28 }
  0xe8   :  { %385 = vmatpush3.msk.msra.mxu1 %vm166_vm3, %v144_v28 }
  0xe9   :  { %387 = vmatmul.mubr.msk.f32.vlgmr.msra.gmra.mrb[0].mxu1 %vm159_vm2, %v146_v29  ;;  %400 = vmatprep.subr.bf16.mxu1 %v439_v30 }
  0xea   :  { %393 = vmatprep.mubr.msk.f32.mxu1 %vm437_vm1, %v436_v1 }
 0x1bc   :  { %v388_v32 = vpop.f32.mrb[0].mxu1 }
 0x1bd   :  { %v242_v34 = vadd.f32 %v388_v32, %v157_v31  ;;  %v236_v35 = vpop.f32.mrb[1].mxu1 }
 0x1be   :  { %v237_v36 = vadd.f32 %v236_v35, %v152_v33 }
 0x1bf   :  { %v246_v37 = vmax.f32 %v242_v34, 0.0 }
 0x1c0   :  { %v245_v38 = vmax.f32 %v237_v36, 0.0 }
 0x1c2   :  { %v401_v39 = vpack.c.bf16 %v246_v37, %v245_v38 }
 0x1c4   :  { %403 = vmatpush3.bf16.msk.msra.mxu1 %vm402_vm6, %v401_v39 }
 0x1c7   :  { %394 = vmatmul.mubr.msk.f32.vlgmr.msra.gmra.mrb[2].mxu1 %vm254_vm7, %v247_v40 }
 0x29a   :  { %v328_v42 = vpop.f32.mrb[2].mxu1 }
 0x29b   :  { %v329_v43 = vadd.f32 %v328_v42, %v252_v41  ;;  %v395_v44 = vpop.f32.mrb[3].mxu1 }
 0x29d   :  { %333 = vst.msk [vmem:[#allocation2] sm:$0x3] %vm332_vm8, %v329_v43 }
 0x29e   :  { %423 = shalt.err (!%p420_p4)
}
 0x29f   :  { %s424_s25 = scalar_lea.hbm %s550_s7, 32 }
 0x2a0   :  { %p425_p5 = scmp.ne.s32.totalorder %s550_s7, %s424_s25  ;;  %p428_p6 = scmp.lt.u32.totalorder %s424_s25, %s550_s7 }
 0x2a2   :  { %p430_p7 = pnand %p428_p6, %p425_p5 }
 0x2a4   :  { %433 = shalt.err (!%p430_p7)
}
 0x2a5   :  { %343 = dma.vmem_to_hbm [thread:$0]  %s341_s22, 32, %s550_s7, [#allocation3]  }
 0x2a6   :  { %434 = dma.done.wait [#allocation3], 32  }
 0x2a7   :  { %435 = vsyncadd [#allocation3], 4294967264 }
 0x2a8   :  { %347 = vsyncpa [#allocation3], 1 }

</bundles_post_ra>
